<compile_context>
chip_gen: v7x
topology: tpu7x:2x2x1
jax: 0.10.0
libtpu: 0.0.40
codegen_flags: <defaults>
</compile_context>

<pallas_src>
import jax
import jax.numpy as jnp
from jax.experimental import pallas as pl
from jax.experimental.pallas import tpu as pltpu


LANE = 128          # TPU lane width  (last-dim tiling unit)
SUBLANE = 8         # TPU sublane width (2nd-to-last-dim tiling unit)
EPS = 1e-5          # BatchNorm2d default eps

_VMEM_LIMIT_CACHE = None


def _round_up(x, m):
    return (x + m - 1) // m * m


def _vmem_limit():
    """Scoped-VMEM limit: ~3/4 of physical, capped at 100 MiB (v5e/v6e -> 96 MiB,
    v7x -> 48 MiB).  Conservative fallback if the hardware query is unavailable."""
    global _VMEM_LIMIT_CACHE
    if _VMEM_LIMIT_CACHE is None:
        try:
            cap = int(pltpu.get_tpu_info().vmem_capacity_bytes)
        except Exception:
            cap = 64 * 1024 * 1024
        _VMEM_LIMIT_CACHE = max(32 * 1024 * 1024,
                                min(cap * 3 // 4, 100 * 1024 * 1024))
    return _VMEM_LIMIT_CACHE


def _tile_m(m, max_tile):
    """M tile: multiple of 8, >= 2 tiles whenever possible (v7x megacore), chosen from
    divisors of round_up(m, 8) to avoid ragged-tail padding."""
    m8 = _round_up(m, SUBLANE)
    if m8 <= max_tile:
        if m8 < 2 * SUBLANE:
            return m8                                    # too small to split
        return _round_up((m8 + 1) // 2, SUBLANE)         # 2 tiles
    for d in range(max_tile, 127, -SUBLANE):             # largest divisor >= 128
        if m8 % d == 0:
            return d
    return max_tile                                      # accept a ragged tail


def _k_tiling(k):
    """(padded K, K tile).  Small K stays un-padded as one resident block; large K is
    tiled at a multiple of 256 (v6e/v7x MXU width) with padding folded into im2col."""
    if k <= 512:
        return k, k
    kp = _round_up(k, 256)
    return kp, (512 if kp % 512 == 0 else 256)


def _pad_rows(a, rows):
    return a if a.shape[0] == rows else jnp.pad(a, ((0, rows - a.shape[0]), (0, 0)))


# ---------------------------------------------------------------------------
# Pallas kernels
# ---------------------------------------------------------------------------
def _make_matmul_bias_kernel(k_tiled):
    """conv1 hot path: z = patches @ w + bias.  Weights are a single VMEM-resident
    block; when K is tiled the kernel slices the (tk, N) chunk it needs."""
    def kernel(p_ref, w_ref, b_ref, o_ref, acc_ref):
        k = pl.program_id(1)

        @pl.when(k == 0)
        def _():
            acc_ref[...] = jnp.zeros_like(acc_ref)

        if k_tiled:
            tk = p_ref.shape[1]
            k0 = pl.multiple_of(k * tk, tk)
            w_blk = w_ref[pl.ds(k0, tk), :]
        else:
            w_blk = w_ref[...]
        acc_ref[...] += jnp.dot(p_ref[...], w_blk,
                                preferred_element_type=jnp.float32)

        @pl.when(k == pl.num_programs(1) - 1)
        def _():
            o_ref[...] = (acc_ref[...] + b_ref[...]).astype(o_ref.dtype)
    return kernel


def _make_matmul_stats_kernel(k_tiled):
    """conv2 hot path: z = patches @ w (bias dropped: BN batch stats cancel it).
    Also emits per-M-tile per-channel sum / sum-of-squares (f32, from the accumulator)
    so the BatchNorm reduction stays correct under M tiling."""
    def kernel(p_ref, w_ref, z_ref, psum_ref, psq_ref, acc_ref):
        k = pl.program_id(1)

        @pl.when(k == 0)
        def _():
            acc_ref[...] = jnp.zeros_like(acc_ref)

        if k_tiled:
            tk = p_ref.shape[1]
            k0 = pl.multiple_of(k * tk, tk)
            w_blk = w_ref[pl.ds(k0, tk), :]
        else:
            w_blk = w_ref[...]
        acc_ref[...] += jnp.dot(p_ref[...], w_blk,
                                preferred_element_type=jnp.float32)

        @pl.when(k == pl.num_programs(1) - 1)
        def _():
            z = acc_ref[...]
            z_ref[...] = z.astype(z_ref.dtype)
            # Broadcast each (1, N) stat row to an (8, N) slab so the stats outputs
            # keep (8, 128)-aligned blocks; row 0 is picked up by the JAX glue.
            psum_ref[...] = jnp.broadcast_to(
                jnp.sum(z, axis=0, keepdims=True), psum_ref.shape)
            psq_ref[...] = jnp.broadcast_to(
                jnp.sum(z * z, axis=0, keepdims=True), psq_ref.shape)
    return kernel


def _bn_silu_kernel(z_ref, scale_ref, shift_ref, o_ref):
    """Elementwise epilogue (f32 math, bf16 output): y = z*scale + shift; out = y*sigmoid(y).
    scale/shift already fold mean/var/gamma/beta.  The sigmoid divide is routed to the
    EUP via pl.reciprocal(approx=True); exact sigmoid would also be fine (mem-bound)."""
    y = z_ref[...].astype(jnp.float32) * scale_ref[...] + shift_ref[...]
    sig = pl.reciprocal(1.0 + jnp.exp(-y), approx=True)
    o_ref[...] = (y * sig).astype(o_ref.dtype)


# ---------------------------------------------------------------------------
# pallas_call wrappers
# ---------------------------------------------------------------------------
def _patch_spec(tm, tk, n_steps):
    # Deeper pipelining on the only large streamed input, but only when the grid is
    # long enough for a third buffer to matter.
    if n_steps >= 3:
        return pl.BlockSpec((tm, tk), lambda i, k: (i, k),
                            pipeline_mode=pl.Buffered(3))
    return pl.BlockSpec((tm, tk), lambda i, k: (i, k))


def _matmul_bias_call(patches, w_mat, bias_row, tm, tk, out_dtype):
    mp, kp = patches.shape
    n = w_mat.shape[1]
    kt = kp // tk
    grid = (mp // tm, kt)
    cost = pl.CostEstimate(
        flops=2 * mp * kp * n,
        transcendentals=0,
        bytes_accessed=(mp * kp * patches.dtype.itemsize
                        + kp * n * w_mat.dtype.itemsize
                        + n * 4
                        + mp * n * jnp.dtype(out_dtype).itemsize))
    return pl.pallas_call(
        _make_matmul_bias_kernel(kt > 1),
        out_shape=jax.ShapeDtypeStruct((mp, n), out_dtype),
        grid_spec=pltpu.PrefetchScalarGridSpec(
            num_scalar_prefetch=0,
            grid=grid,
            in_specs=[
                _patch_spec(tm, tk, grid[0] * grid[1]),       # patches: streamed
                pl.BlockSpec((kp, n), lambda i, k: (0, 0)),   # weights: resident (1 DMA)
                pl.BlockSpec((1, n), lambda i, k: (0, 0)),    # bias: resident
            ],
            out_specs=pl.BlockSpec((tm, n), lambda i, k: (i, 0)),
            scratch_shapes=[pltpu.VMEM((tm, n), jnp.float32)],
        ),
        compiler_params=pltpu.CompilerParams(
            dimension_semantics=("parallel", "arbitrary"),
            vmem_limit_bytes=_vmem_limit()),
        cost_estimate=cost,
    )(patches, w_mat, bias_row)


def _matmul_stats_call(patches, w_mat, tm, tk, z_dtype):
    mp, kp = patches.shape
    n = w_mat.shape[1]
    mt = mp // tm
    kt = kp // tk
    grid = (mt, kt)
    cost = pl.CostEstimate(
        flops=2 * mp * kp * n + 4 * mp * n,
        transcendentals=0,
        bytes_accessed=(mp * kp * patches.dtype.itemsize
                        + kp * n * w_mat.dtype.itemsize
                        + mp * n * jnp.dtype(z_dtype).itemsize
                        + 2 * mt * SUBLANE * n * 4))
    return pl.pallas_call(
        _make_matmul_stats_kernel(kt > 1),
        out_shape=(jax.ShapeDtypeStruct((mp, n), z_dtype),
                   jax.ShapeDtypeStruct((mt * SUBLANE, n), jnp.float32),
                   jax.ShapeDtypeStruct((mt * SUBLANE, n), jnp.float32)),
        grid_spec=pltpu.PrefetchScalarGridSpec(
            num_scalar_prefetch=0,
            grid=grid,
            in_specs=[
                _patch_spec(tm, tk, grid[0] * grid[1]),
                pl.BlockSpec((kp, n), lambda i, k: (0, 0)),   # weights: resident
            ],
            out_specs=[
                pl.BlockSpec((tm, n), lambda i, k: (i, 0)),
                pl.BlockSpec((SUBLANE, n), lambda i, k: (i, 0)),
                pl.BlockSpec((SUBLANE, n), lambda i, k: (i, 0)),
            ],
            scratch_shapes=[pltpu.VMEM((tm, n), jnp.float32)],
        ),
        compiler_params=pltpu.CompilerParams(
            dimension_semantics=("parallel", "arbitrary"),
            vmem_limit_bytes=_vmem_limit()),
        cost_estimate=cost,
    )(patches, w_mat)


def _bn_silu_call(z, scale_row, shift_row, tm, out_dtype):
    mp, n = z.shape
    grid = (mp // tm,)
    cost = pl.CostEstimate(
        flops=5 * mp * n,
        transcendentals=mp * n,
        bytes_accessed=mp * n * (z.dtype.itemsize + jnp.dtype(out_dtype).itemsize))
    return pl.pallas_call(
        _bn_silu_kernel,
        out_shape=jax.ShapeDtypeStruct((mp, n), out_dtype),
        grid_spec=pltpu.PrefetchScalarGridSpec(
            num_scalar_prefetch=0,
            grid=grid,
            in_specs=[
                pl.BlockSpec((tm, n), lambda i: (i, 0)),
                pl.BlockSpec((1, n), lambda i: (0, 0)),   # resident
                pl.BlockSpec((1, n), lambda i: (0, 0)),   # resident
            ],
            out_specs=pl.BlockSpec((tm, n), lambda i: (i, 0)),
        ),
        compiler_params=pltpu.CompilerParams(
            dimension_semantics=("parallel",),
            vmem_limit_bytes=_vmem_limit()),
        cost_estimate=cost,
    )(z, scale_row, shift_row)


# ---------------------------------------------------------------------------
# JAX glue: im2col (pad + static shifted slices, built in bf16; optional K padding
# folded into the concatenate so no extra jnp.pad pass) + weight layout
# ---------------------------------------------------------------------------
def _im2col(x_nhwc, kh, kw, stride, pad, k_pad_to):
    B, H, W, C = x_nhwc.shape
    xp = jnp.pad(x_nhwc, ((0, 0), (pad, pad), (pad, pad), (0, 0)))
    Ho = (H + 2 * pad - kh) // stride + 1
    Wo = (W + 2 * pad - kw) // stride + 1
    cols = [xp[:, i:i + stride * Ho:stride, j:j + stride * Wo:stride, :]
            for i in range(kh) for j in range(kw)]        # tap-major, channel-minor
    k = kh * kw * C
    if k_pad_to > k:                                      # fold K padding into concat
        cols.append(jnp.zeros((B, Ho, Wo, k_pad_to - k), x_nhwc.dtype))
        k = k_pad_to
    patches = jnp.concatenate(cols, axis=-1)
    return patches.reshape(B * Ho * Wo, k), (Ho, Wo)


def _conv_weight_to_mat(w_oihw, k_pad_to, n_pad_to, dtype):
    # (O, I, KH, KW) -> (KH*KW*I, O), matching the im2col column ordering.
    O, I, KH, KW = w_oihw.shape
    w = jnp.transpose(w_oihw, (2, 3, 1, 0)).reshape(KH * KW * I, O)
    return jnp.pad(w, ((0, k_pad_to - KH * KW * I), (0, n_pad_to - O))).astype(dtype)


# ---------------------------------------------------------------------------
# DownBlock forward
# ---------------------------------------------------------------------------
@jax.jit
def down_block_forward(x_nchw, w1, b1, w2, b2, gamma, beta):
    B, C_in, H, W = x_nchw.shape
    C_out = w1.shape[0]
    N = _round_up(C_out, LANE)          # lane-dense output channel dimension
    compute_dtype = jnp.bfloat16        # MXU inputs; accumulation stays f32
    max_tm = 1024 if _vmem_limit() >= 64 * 1024 * 1024 else 512   # v5e/v6e vs v7x

    # NCHW -> NHWC (channels on the lane dim); required by the NCHW module interface.
    x = jnp.transpose(x_nchw, (0, 2, 3, 1)).astype(compute_dtype)

    # ---------------- conv1: 3x3 / stride 1 / pad 'same' (+ bias) ----------------
    K1p, TK1 = _k_tiling(9 * C_in)                      # no padding when K <= 512
    p1, _ = _im2col(x, 3, 3, stride=1, pad=1, k_pad_to=K1p)
    M1 = p1.shape[0]
    TM1 = _tile_m(M1, max_tm)
    M1p = _round_up(_round_up(M1, SUBLANE), TM1)
    p1 = _pad_rows(p1, M1p)                             # no-op unless M is ragged
    w1m = _conv_weight_to_mat(w1, K1p, N, compute_dtype)
    b1row = jnp.pad(b1, (0, N - C_out)).astype(jnp.float32).reshape(1, N)

    z1 = _matmul_bias_call(p1, w1m, b1row, TM1, TK1, compute_dtype)
    # drop M padding and padded output channels before conv2's patches
    z1 = z1[:M1, :C_out].reshape(B, H, W, C_out)

    # ------------- conv2: 4x4 / stride 2 / pad 1 (+ BN batch stats + SiLU) -------
    K2p, TK2 = _k_tiling(16 * C_out)
    p2, (Ho, Wo) = _im2col(z1, 4, 4, stride=2, pad=1, k_pad_to=K2p)
    M2 = p2.shape[0]
    TM2 = _tile_m(M2, max_tm)
    M2p = _round_up(_round_up(M2, SUBLANE), TM2)
    p2 = _pad_rows(p2, M2p)
    w2m = _conv_weight_to_mat(w2, K2p, N, compute_dtype)
    # NOTE: b2 is intentionally NOT used — BatchNorm with batch statistics (training
    # mode, PyTorch default) subtracts the per-channel mean, making it an exact no-op.
    # If the module is ever run with running stats (eval), b2 must be re-added.

    z2, ps, pq = _matmul_stats_call(p2, w2m, TM2, TK2, compute_dtype)

    # Tiny JAX glue: reduce per-tile partials, fold BN into scale/shift (f32).
    # Padded M rows / K cols / N cols are exact zeros, so they contribute nothing to
    # the sums; divide by the true element count.  (var = E[z^2]-mean^2 in f32; fine
    # for activation-scale values, clamped at 0 for safety.)
    mt2 = M2p // TM2
    ps = ps.reshape(mt2, SUBLANE, N)[:, 0, :]
    pq = pq.reshape(mt2, SUBLANE, N)[:, 0, :]
    count = jnp.float32(B * Ho * Wo)
    mean = jnp.sum(ps, axis=0, keepdims=True) / count
    var = jnp.maximum(jnp.sum(pq, axis=0, keepdims=True) / count - mean * mean, 0.0)
    g = jnp.pad(gamma, (0, N - C_out)).astype(jnp.float32).reshape(1, N)
    bt = jnp.pad(beta, (0, N - C_out)).astype(jnp.float32).reshape(1, N)
    scale = g * jax.lax.rsqrt(var + EPS)
    shift = bt - mean * scale

    # bf16 epilogue output halves the write stream and the transpose traffic.
    out = _bn_silu_call(z2, scale, shift, TM2, compute_dtype)
    out = out[:M2, :C_out].reshape(B, Ho, Wo, C_out)

    assert (Ho, Wo) == (H // 2, W // 2), "Not compatible size!"
    # back to NCHW (module interface); cast to f32 on the smallest tensor, at the end.
    return jnp.transpose(out, (0, 3, 1, 2)).astype(jnp.float32)


# ---------------------------------------------------------------------------
# Pure-JAX f32 reference (for verification)
# ---------------------------------------------------------------------------
def reference_forward(x, w1, b1, w2, b2, gamma, beta):
    dn = ("NCHW", "OIHW", "NCHW")
    y = jax.lax.conv_general_dilated(x, w1, (1, 1), ((1, 1), (1, 1)),
                                     dimension_numbers=dn) + b1[None, :, None, None]
    y = jax.lax.conv_general_dilated(y, w2, (2, 2), ((1, 1), (1, 1)),
                                     dimension_numbers=dn) + b2[None, :, None, None]
    mean = y.mean(axis=(0, 2, 3), keepdims=True)
    var = ((y - mean) ** 2).mean(axis=(0, 2, 3), keepdims=True)
    yn = (y - mean) / jnp.sqrt(var + EPS)
    yn = yn * gamma[None, :, None, None] + beta[None, :, None, None]
    return yn * jax.nn.sigmoid(yn)


if __name__ == "__main__":
    B, C_in, C_out, H, W = 2, 4, 8, 16, 16
    key = jax.random.PRNGKey(0)
    k0, k1, k2, k3, k4, k5, k6 = jax.random.split(key, 7)

    x = jax.random.normal(k0, (B, C_in, H, W), dtype=jnp.float32)
    w1 = 0.1 * jax.random.normal(k1, (C_out, C_in, 3, 3), dtype=jnp.float32)
    b1 = 0.1 * jax.random.normal(k2, (C_out,), dtype=jnp.float32)
    w2 = 0.1 * jax.random.normal(k3, (C_out, C_out, 4, 4), dtype=jnp.float32)
    b2 = 0.1 * jax.random.normal(k4, (C_out,), dtype=jnp.float32)
    gamma = 1.0 + 0.1 * jax.random.normal(k5, (C_out,), dtype=jnp.float32)
    beta = 0.1 * jax.random.normal(k6, (C_out,), dtype=jnp.float32)

    out = jax.block_until_ready(down_block_forward(x, w1, b1, w2, b2, gamma, beta))
    ref = reference_forward(x, w1, b1, w2, b2, gamma, beta)

    assert out.shape == (B, C_out, H // 2, W // 2), out.shape
    max_err = float(jnp.max(jnp.abs(out - ref)))
    # bf16 MXU inputs + bf16 epilogue output -> relaxed tolerance vs all-f32 reference.
    assert jnp.allclose(out, ref, rtol=5e-2, atol=5e-2), max_err

    print("KERNEL_OK")
</pallas_src>

<mosaic_0001>
module attributes {stable_mosaic.version = 11 : i64} {
  func.func @kernel(%arg0: i32, %arg1: i32, %arg2: memref<256x36xbf16, #tpu.memory_space<vmem>>, %arg3: memref<36x128xbf16, #tpu.memory_space<vmem>>, %arg4: memref<1x128xf32, #tpu.memory_space<vmem>>, %arg5: memref<256x128xbf16, #tpu.memory_space<vmem>>, %arg6: memref<256x128xf32, #tpu.memory_space<vmem>>) attributes {dimension_semantics = [#tpu.dimension_semantics<parallel>, #tpu.dimension_semantics<arbitrary>], iteration_bounds = array<i64: 2, 1>, scalar_prefetch = 0 : i64, scratch_operands = 1 : i64, tpu.core_type = #tpu.core_type<tc>, window_params = [{transform_indices = @transform_0, window_bounds = array<i64: 256, 36>}, {pipeline_mode = #tpu.pipeline_mode<synchronous>, transform_indices = @transform_1, window_bounds = array<i64: 36, 128>}, {pipeline_mode = #tpu.pipeline_mode<synchronous>, transform_indices = @transform_2, window_bounds = array<i64: 1, 128>}, {transform_indices = @transform_3, window_bounds = array<i64: 256, 128>}]} {
    %c0_i32 = arith.constant 0 : i32
    %0 = arith.cmpi eq, %arg1, %c0_i32 : i32
    %1 = arith.extui %0 : i1 to i32
    %c0_i32_0 = arith.constant 0 : i32
    %2 = arith.cmpi ne, %1, %c0_i32_0 : i32
    scf.if %2 {
      %cst_10 = arith.constant 0.000000e+00 : f32
      %12 = vector.broadcast %cst_10 : f32 to vector<256x128xf32>
      %c0_11 = arith.constant 0 : index
      %c0_12 = arith.constant 0 : index
      %13 = vector.load %arg6[%c0_11, %c0_12] : memref<256x128xf32, #tpu.memory_space<vmem>>, vector<256x128xf32>
      tpu.vector_store %arg6[%c0_11, %c0_12], %12 {strides = array<i32>} : memref<256x128xf32, #tpu.memory_space<vmem>>, vector<256x128xf32>,
    } else {
    }
    %c0 = arith.constant 0 : index
    %c0_1 = arith.constant 0 : index
    %3 = vector.load %arg3[%c0, %c0_1] : memref<36x128xbf16, #tpu.memory_space<vmem>>, vector<36x128xbf16>
    %c0_2 = arith.constant 0 : index
    %c0_3 = arith.constant 0 : index
    %4 = vector.load %arg6[%c0_2, %c0_3] : memref<256x128xf32, #tpu.memory_space<vmem>>, vector<256x128xf32>
    %c0_4 = arith.constant 0 : index
    %c0_5 = arith.constant 0 : index
    %5 = vector.load %arg2[%c0_4, %c0_5] : memref<256x36xbf16, #tpu.memory_space<vmem>>, vector<256x36xbf16>
    %cst = arith.constant dense<0.000000e+00> : vector<256x128xf32>
    %6 = tpu.matmul %5, %3, %cst {dimension_numbers = #tpu.dot_dimension_numbers<[1], [0], [0], [1], [0, 0, 1, 1], [], []>} : vector<256x36xbf16>, vector<36x128xbf16>, vector<256x128xf32> -> vector<256x128xf32>
    %7 = arith.addf %4, %6 : vector<256x128xf32>
    %c0_6 = arith.constant 0 : index
    %c0_7 = arith.constant 0 : index
    %8 = vector.load %arg6[%c0_6, %c0_7] : memref<256x128xf32, #tpu.memory_space<vmem>>, vector<256x128xf32>
    tpu.vector_store %arg6[%c0_6, %c0_7], %7 {strides = array<i32>} : memref<256x128xf32, #tpu.memory_space<vmem>>, vector<256x128xf32>,
    %c0_i32_8 = arith.constant 0 : i32
    %9 = arith.cmpi eq, %arg1, %c0_i32_8 : i32
    %10 = arith.extui %9 : i1 to i32
    %c0_i32_9 = arith.constant 0 : i32
    %11 = arith.cmpi ne, %10, %c0_i32_9 : i32
    scf.if %11 {
      %c0_10 = arith.constant 0 : index
      %c0_11 = arith.constant 0 : index
      %12 = vector.load %arg6[%c0_10, %c0_11] : memref<256x128xf32, #tpu.memory_space<vmem>>, vector<256x128xf32>
      %c0_12 = arith.constant 0 : index
      %c0_13 = arith.constant 0 : index
      %13 = vector.load %arg4[%c0_12, %c0_13] : memref<1x128xf32, #tpu.memory_space<vmem>>, vector<1x128xf32>
      %14 = vector.broadcast %13 : vector<1x128xf32> to vector<256x128xf32>
      %15 = arith.addf %12, %14 : vector<256x128xf32>
      %16 = arith.truncf %15 : vector<256x128xf32> to vector<256x128xbf16>
      %c0_14 = arith.constant 0 : index
      %c0_15 = arith.constant 0 : index
      %17 = vector.load %arg5[%c0_14, %c0_15] : memref<256x128xbf16, #tpu.memory_space<vmem>>, vector<256x128xbf16>
      tpu.vector_store %arg5[%c0_14, %c0_15], %16 {strides = array<i32>} : memref<256x128xbf16, #tpu.memory_space<vmem>>, vector<256x128xbf16>,
    } else {
    }
    return
  }
  func.func @transform_0(%arg0: i32, %arg1: i32) -> (i32, i32) {
    %c0_i32 = arith.constant 0 : i32
    return %arg0, %arg1 : i32, i32
  }
  func.func @transform_1(%arg0: i32, %arg1: i32) -> (i32, i32) {
    %c0_i32 = arith.constant 0 : i32
    %c0_i32_0 = arith.constant 0 : i32
    %c0_i32_1 = arith.constant 0 : i32
    return %c0_i32, %c0_i32_0 : i32, i32
  }
  func.func @transform_2(%arg0: i32, %arg1: i32) -> (i32, i32) {
    %c0_i32 = arith.constant 0 : i32
    %c0_i32_0 = arith.constant 0 : i32
    %c0_i32_1 = arith.constant 0 : i32
    return %c0_i32, %c0_i32_0 : i32, i32
  }
  func.func @transform_3(%arg0: i32, %arg1: i32) -> (i32, i32) {
    %c0_i32 = arith.constant 0 : i32
    %c0_i32_0 = arith.constant 0 : i32
    return %arg0, %c0_i32 : i32, i32
  }
}

module attributes {stable_mosaic.version = 11 : i64} {
  func.func @kernel(%arg0: i32, %arg1: i32, %arg2: memref<64x128xbf16, #tpu.memory_space<vmem>>, %arg3: memref<128x128xbf16, #tpu.memory_space<vmem>>, %arg4: memref<64x128xbf16, #tpu.memory_space<vmem>>, %arg5: memref<8x128xf32, #tpu.memory_space<vmem>>, %arg6: memref<8x128xf32, #tpu.memory_space<vmem>>, %arg7: memref<64x128xf32, #tpu.memory_space<vmem>>) attributes {dimension_semantics = [#tpu.dimension_semantics<parallel>, #tpu.dimension_semantics<arbitrary>], iteration_bounds = array<i64: 2, 1>, scalar_prefetch = 0 : i64, scratch_operands = 1 : i64, tpu.core_type = #tpu.core_type<tc>, window_params = [{transform_indices = @transform_0, window_bounds = array<i64: 64, 128>}, {pipeline_mode = #tpu.pipeline_mode<synchronous>, transform_indices = @transform_1, window_bounds = array<i64: 128, 128>}, {transform_indices = @transform_2, window_bounds = array<i64: 64, 128>}, {transform_indices = @transform_3, window_bounds = array<i64: 8, 128>}, {transform_indices = @transform_4, window_bounds = array<i64: 8, 128>}]} {
    %c0_i32 = arith.constant 0 : i32
    %0 = arith.cmpi eq, %arg1, %c0_i32 : i32
    %1 = arith.extui %0 : i1 to i32
    %c0_i32_0 = arith.constant 0 : i32
    %2 = arith.cmpi ne, %1, %c0_i32_0 : i32
    scf.if %2 {
      %cst_10 = arith.constant 0.000000e+00 : f32
      %12 = vector.broadcast %cst_10 : f32 to vector<64x128xf32>
      %c0_11 = arith.constant 0 : index
      %c0_12 = arith.constant 0 : index
      %13 = vector.load %arg7[%c0_11, %c0_12] : memref<64x128xf32, #tpu.memory_space<vmem>>, vector<64x128xf32>
      tpu.vector_store %arg7[%c0_11, %c0_12], %12 {strides = array<i32>} : memref<64x128xf32, #tpu.memory_space<vmem>>, vector<64x128xf32>,
    } else {
    }
    %c0 = arith.constant 0 : index
    %c0_1 = arith.constant 0 : index
    %3 = vector.load %arg3[%c0, %c0_1] : memref<128x128xbf16, #tpu.memory_space<vmem>>, vector<128x128xbf16>
    %c0_2 = arith.constant 0 : index
    %c0_3 = arith.constant 0 : index
    %4 = vector.load %arg7[%c0_2, %c0_3] : memref<64x128xf32, #tpu.memory_space<vmem>>, vector<64x128xf32>
    %c0_4 = arith.constant 0 : index
    %c0_5 = arith.constant 0 : index
    %5 = vector.load %arg2[%c0_4, %c0_5] : memref<64x128xbf16, #tpu.memory_space<vmem>>, vector<64x128xbf16>
    %cst = arith.constant dense<0.000000e+00> : vector<64x128xf32>
    %6 = tpu.matmul %5, %3, %cst {dimension_numbers = #tpu.dot_dimension_numbers<[1], [0], [0], [1], [0, 0, 1, 1], [], []>} : vector<64x128xbf16>, vector<128x128xbf16>, vector<64x128xf32> -> vector<64x128xf32>
    %7 = arith.addf %4, %6 : vector<64x128xf32>
    %c0_6 = arith.constant 0 : index
    %c0_7 = arith.constant 0 : index
    %8 = vector.load %arg7[%c0_6, %c0_7] : memref<64x128xf32, #tpu.memory_space<vmem>>, vector<64x128xf32>
    tpu.vector_store %arg7[%c0_6, %c0_7], %7 {strides = array<i32>} : memref<64x128xf32, #tpu.memory_space<vmem>>, vector<64x128xf32>,
    %c0_i32_8 = arith.constant 0 : i32
    %9 = arith.cmpi eq, %arg1, %c0_i32_8 : i32
    %10 = arith.extui %9 : i1 to i32
    %c0_i32_9 = arith.constant 0 : i32
    %11 = arith.cmpi ne, %10, %c0_i32_9 : i32
    scf.if %11 {
      %c0_10 = arith.constant 0 : index
      %c0_11 = arith.constant 0 : index
      %12 = vector.load %arg7[%c0_10, %c0_11] : memref<64x128xf32, #tpu.memory_space<vmem>>, vector<64x128xf32>
      %13 = arith.truncf %12 : vector<64x128xf32> to vector<64x128xbf16>
      %c0_12 = arith.constant 0 : index
      %c0_13 = arith.constant 0 : index
      %14 = vector.load %arg4[%c0_12, %c0_13] : memref<64x128xbf16, #tpu.memory_space<vmem>>, vector<64x128xbf16>
      tpu.vector_store %arg4[%c0_12, %c0_13], %13 {strides = array<i32>} : memref<64x128xbf16, #tpu.memory_space<vmem>>, vector<64x128xbf16>,
      %cst_14 = arith.constant dense<0.000000e+00> : vector<128xf32>
      %15 = vector.multi_reduction <add>, %12, %cst_14 [0] : vector<64x128xf32> to vector<128xf32>
      %16 = vector.shape_cast %15 : vector<128xf32> to vector<1x128xf32>
      %17 = vector.shape_cast %16 : vector<1x128xf32> to vector<1x128xf32>
      %18 = vector.broadcast %17 : vector<1x128xf32> to vector<8x128xf32>
      %c0_15 = arith.constant 0 : index
      %c0_16 = arith.constant 0 : index
      %19 = vector.load %arg5[%c0_15, %c0_16] : memref<8x128xf32, #tpu.memory_space<vmem>>, vector<8x128xf32>
      tpu.vector_store %arg5[%c0_15, %c0_16], %18 {strides = array<i32>} : memref<8x128xf32, #tpu.memory_space<vmem>>, vector<8x128xf32>,
      %20 = arith.mulf %12, %12 : vector<64x128xf32>
      %cst_17 = arith.constant dense<0.000000e+00> : vector<128xf32>
      %21 = vector.multi_reduction <add>, %20, %cst_17 [0] : vector<64x128xf32> to vector<128xf32>
      %22 = vector.shape_cast %21 : vector<128xf32> to vector<1x128xf32>
      %23 = vector.shape_cast %22 : vector<1x128xf32> to vector<1x128xf32>
      %24 = vector.broadcast %23 : vector<1x128xf32> to vector<8x128xf32>
      %c0_18 = arith.constant 0 : index
      %c0_19 = arith.constant 0 : index
      %25 = vector.load %arg6[%c0_18, %c0_19] : memref<8x128xf32, #tpu.memory_space<vmem>>, vector<8x128xf32>
      tpu.vector_store %arg6[%c0_18, %c0_19], %24 {strides = array<i32>} : memref<8x128xf32, #tpu.memory_space<vmem>>, vector<8x128xf32>,
    } else {
    }
    return
  }
  func.func @transform_0(%arg0: i32, %arg1: i32) -> (i32, i32) {
    %c0_i32 = arith.constant 0 : i32
    return %arg0, %arg1 : i32, i32
  }
  func.func @transform_1(%arg0: i32, %arg1: i32) -> (i32, i32) {
    %c0_i32 = arith.constant 0 : i32
    %c0_i32_0 = arith.constant 0 : i32
    %c0_i32_1 = arith.constant 0 : i32
    return %c0_i32, %c0_i32_0 : i32, i32
  }
  func.func @transform_2(%arg0: i32, %arg1: i32) -> (i32, i32) {
    %c0_i32 = arith.constant 0 : i32
    %c0_i32_0 = arith.constant 0 : i32
    return %arg0, %c0_i32 : i32, i32
  }
  func.func @transform_3(%arg0: i32, %arg1: i32) -> (i32, i32) {
    %c0_i32 = arith.constant 0 : i32
    %c0_i32_0 = arith.constant 0 : i32
    return %arg0, %c0_i32 : i32, i32
  }
  func.func @transform_4(%arg0: i32, %arg1: i32) -> (i32, i32) {
    %c0_i32 = arith.constant 0 : i32
    %c0_i32_0 = arith.constant 0 : i32
    return %arg0, %c0_i32 : i32, i32
  }
}

module attributes {stable_mosaic.version = 11 : i64} {
  func.func @_bn_silu_kernel(%arg0: i32, %arg1: memref<64x128xbf16, #tpu.memory_space<vmem>>, %arg2: memref<1x128xf32, #tpu.memory_space<vmem>>, %arg3: memref<1x128xf32, #tpu.memory_space<vmem>>, %arg4: memref<64x128xbf16, #tpu.memory_space<vmem>>) attributes {dimension_semantics = [#tpu.dimension_semantics<parallel>], iteration_bounds = array<i64: 2>, scalar_prefetch = 0 : i64, scratch_operands = 0 : i64, tpu.core_type = #tpu.core_type<tc>, window_params = [{transform_indices = @transform_0, window_bounds = array<i64: 64, 128>}, {pipeline_mode = #tpu.pipeline_mode<synchronous>, transform_indices = @transform_1, window_bounds = array<i64: 1, 128>}, {pipeline_mode = #tpu.pipeline_mode<synchronous>, transform_indices = @transform_2, window_bounds = array<i64: 1, 128>}, {transform_indices = @transform_3, window_bounds = array<i64: 64, 128>}]} {
    %c0 = arith.constant 0 : index
    %c0_0 = arith.constant 0 : index
    %0 = vector.load %arg1[%c0, %c0_0] : memref<64x128xbf16, #tpu.memory_space<vmem>>, vector<64x128xbf16>
    %1 = arith.extf %0 : vector<64x128xbf16> to vector<64x128xf32>
    %c0_1 = arith.constant 0 : index
    %c0_2 = arith.constant 0 : index
    %2 = vector.load %arg2[%c0_1, %c0_2] : memref<1x128xf32, #tpu.memory_space<vmem>>, vector<1x128xf32>
    %3 = vector.broadcast %2 : vector<1x128xf32> to vector<64x128xf32>
    %4 = arith.mulf %1, %3 : vector<64x128xf32>
    %c0_3 = arith.constant 0 : index
    %c0_4 = arith.constant 0 : index
    %5 = vector.load %arg3[%c0_3, %c0_4] : memref<1x128xf32, #tpu.memory_space<vmem>>, vector<1x128xf32>
    %6 = vector.broadcast %5 : vector<1x128xf32> to vector<64x128xf32>
    %7 = arith.addf %4, %6 : vector<64x128xf32>
    %cst = arith.constant 0.000000e+00 : f32
    %8 = vector.broadcast %cst : f32 to vector<64x128xf32>
    %9 = arith.subf %8, %7 : vector<64x128xf32>
    %10 = math.exp %9 : vector<64x128xf32>
    %cst_5 = arith.constant 1.000000e+00 : f32
    %11 = vector.broadcast %cst_5 : f32 to vector<64x128xf32>
    %12 = arith.addf %11, %10 : vector<64x128xf32>
    %13 = tpu.reciprocal %12 {approx = true} : vector<64x128xf32> -> vector<64x128xf32>
    %14 = arith.mulf %7, %13 : vector<64x128xf32>
    %15 = arith.truncf %14 : vector<64x128xf32> to vector<64x128xbf16>
    %c0_6 = arith.constant 0 : index
    %c0_7 = arith.constant 0 : index
    %16 = vector.load %arg4[%c0_6, %c0_7] : memref<64x128xbf16, #tpu.memory_space<vmem>>, vector<64x128xbf16>
    tpu.vector_store %arg4[%c0_6, %c0_7], %15 {strides = array<i32>} : memref<64x128xbf16, #tpu.memory_space<vmem>>, vector<64x128xbf16>,
    return
  }
  func.func @transform_0(%arg0: i32) -> (i32, i32) {
    %c0_i32 = arith.constant 0 : i32
    %c0_i32_0 = arith.constant 0 : i32
    return %arg0, %c0_i32 : i32, i32
  }
  func.func @transform_1(%arg0: i32) -> (i32, i32) {
    %c0_i32 = arith.constant 0 : i32
    %c0_i32_0 = arith.constant 0 : i32
    %c0_i32_1 = arith.constant 0 : i32
    return %c0_i32, %c0_i32_0 : i32, i32
  }
  func.func @transform_2(%arg0: i32) -> (i32, i32) {
    %c0_i32 = arith.constant 0 : i32
    %c0_i32_0 = arith.constant 0 : i32
    %c0_i32_1 = arith.constant 0 : i32
    return %c0_i32, %c0_i32_0 : i32, i32
  }
  func.func @transform_3(%arg0: i32) -> (i32, i32) {
    %c0_i32 = arith.constant 0 : i32
    %c0_i32_0 = arith.constant 0 : i32
    return %arg0, %c0_i32 : i32, i32
  }
}

</mosaic_0001>

<bundles_post_ra>
// kernel: down_block_forward.3
= control target key start
LH: loop header
LB: loop body
LE: loop exit
PB: predicated region body
PF: predicated region fallthrough
CT: control target
= control target key end

     0   :  { %s1336_s12 = smov 0   ;;  %s1338_s13 = smov 0   ;;  %s1474_s0 = inlined_call_operand.vmem [shape: bf16[512,36], index: 0, kind: input, shape index: {}]   ;;  %s1475_s1 = inlined_call_operand.vmem [shape: bf16[36,128], index: 1, kind: input, shape index: {}]   ;;  %s1476_s2 = inlined_call_operand.vmem [shape: f32[1,128], index: 2, kind: input, shape index: {}]   ;;  %s1477_s3 = inlined_call_operand.vmem [shape: bf16[512,128], index: 3, kind: output, shape index: {}]  }
   0x1   :  { %s1340_s14 = smov 0  }
   0x2 LB: > { %s25_s15 = sadd.s32 1, %s1310_s13  ;;  %p982_p0 = scmp.ge.s32.totalorder %s1314_s14, 1  ;;  %s1314_s14 = sphi %s1340_s14, %s13_s14   ;;  %s1310_s13 = sphi %s1338_s13, %s1479_s13   ;;  %s1306_s12 = sphi %s1336_s12, %s1478_s12  }
   0x3   : > { %p27_p1 = scmp.ge.s32.totalorder %s25_s15, 2  ;;  %p155_p2 = scmp.lt.s32.totalorder %s1314_s14, 3 }
   0x5   : > { %s1481_s15 = smov (%p27_p1, %s25_s15), 0  ;;  %p156_p3 = pnand %p982_p0, %p155_p2 }
   0x6   : > { %v1273_v0 = vld [vmem:[%s1475_s1] sm:$0xff] (!%p156_p3)   ;;  %v1274_v1 = vld [vmem:[%s1475_s1 + $0x8] sm:$0xff] (!%p156_p3)   ;;  %s983_s20 = sshll.u32 (!%p156_p3), %s1306_s12, 5  ;;  %v1275_v2 = vld [vmem:[%s1475_s1 + $0x10] ss:$0 sps:$4 sm:$0x33] (!%p156_p3)  }
   0x7   : > { %159 = sbr.rel (%p156_p3) target bundleno = 264 (0x108), region = 32  ;;  %1203 = vmatprep.subr.bf16.mxu0 (!%p156_p3), %v1273_v0  ;;  %1241 = vmatprep.subr.bf16.mxu1 (!%p156_p3), %v1273_v0  ;;  %p183_p4 = scmp.lt.s32.totalorder (!%p156_p3), %s983_s20, 63  ;;  %vm447_vm0 = vcmask (!%p156_p3), 1041408   ;;  %vm398_vm1 = vcmask (!%p156_p3), 293888   ;;  %v1408_v21 = vld [vmem:[%s1476_s2] ss:$0 sm:$0xff] (!%p156_p3) }
   0x8   : > { %1204 = vmatpush3.bf16.msra.mxu0 (!%p156_p3), %v1273_v0  ;;  %1244 = vmatpush3.bf16.msra.mxu1 (!%p156_p3), %v1273_v0  ;;  %v449_v3 = vsel (!%p156_p3), %vm447_vm0, %v1275_v2, 0 }
   0x9   : > { %1205 = vmatprep.subr.bf16.mxu0 (!%p156_p3), %v1274_v1  ;;  %1242 = vmatprep.subr.bf16.mxu1 (!%p156_p3), %v1274_v1 }
   0xc   : > { %1206 = vmatpush3.bf16.msra.mxu0 (!%p156_p3), %v1274_v1  ;;  %1245 = vmatpush3.bf16.msra.mxu1 (!%p156_p3), %v1274_v1 }
   0xd   : > { %1247 = vmatprep.subr.msk.bf16.mxu0 (!%p156_p3), %vm447_vm0, %v1275_v2  ;;  %1248 = vmatprep.subr.msk.bf16.mxu1 (!%p156_p3), %vm447_vm0, %v1275_v2 }
   0xe   : > { %s1483_s20 = smov (!%p183_p4, %s983_s20), 63 }
   0xf   : > { %s984_s23 = sshll.u32 %s1483_s20, 2 }
  0x10   : > { %s1371_s26 = scalar_lea.vmem %s1474_s0, %s984_s23  ;;  %1208 = vmatpush3.bf16.msra.mxu0 %v449_v3  ;;  %1246 = vmatpush3.bf16.msra.mxu1 %v449_v3  ;;  %s1421_s4 = scalar_lea.vmem %s1477_s3, %s984_s23 }
  0x11   : > { %v1276_v4 = vld [vmem:[%s1371_s26] sm:$0xff]   ;;  %v1278_v6 = vld [vmem:[%s1371_s26 + $0x8] sm:$0xff]   ;;  %v1280_v8 = vld [vmem:[%s1371_s26 + $0x10] sm:$0xff]  }
  0x12   : > { %v1277_v5 = vld [vmem:[%s1371_s26 + $0x40] sm:$0xff]   ;;  %1209 = vmatprep.mubr.msk.bf16.mxu0 %vm398_vm1, %v1276_v4  ;;  %v1279_v7 = vld [vmem:[%s1371_s26 + $0x48] sm:$0xff]   ;;  %v1281_v9 = vld [vmem:[%s1371_s26 + $0x50] sm:$0xff]  }
  0x13   : > { %1225 = vmatprep.mubr.msk.bf16.mxu1 %vm398_vm1, %v1277_v5  ;;  %1210 = vmatmul.mubr.msk.bf16.vlgmr.msra.gmra.mrb[0].mxu0 %vm398_vm1, %v1278_v6  ;;  %v1282_v10 = vld [vmem:[%s1371_s26 + $0x18] sm:$0xff]   ;;  %v1284_v12 = vld [vmem:[%s1371_s26 + $0x20] sm:$0xff]   ;;  %v1286_v14 = vld [vmem:[%s1371_s26 + $0x28] sm:$0xff]  }
  0x14   : > { %1226 = vmatmul.mubr.msk.bf16.vlgmr.msra.gmra.mrb[0].mxu1 %vm398_vm1, %v1279_v7  ;;  %1213 = vmatprep.mubr.msk.bf16.mxu0 %vm398_vm1, %v1280_v8  ;;  %v1283_v11 = vld [vmem:[%s1371_s26 + $0x58] sm:$0xff]   ;;  %v1285_v13 = vld [vmem:[%s1371_s26 + $0x60] sm:$0xff]   ;;  %v1287_v15 = vld [vmem:[%s1371_s26 + $0x68] sm:$0xff]  }
  0x15   : > { %1229 = vmatprep.mubr.msk.bf16.mxu1 %vm398_vm1, %v1281_v9  ;;  %v1288_v16 = vld [vmem:[%s1371_s26 + $0x30] sm:$0xff]   ;;  %v1290_v18 = vld [vmem:[%s1371_s26 + $0x38] sm:$0xff]  }
  0x16   : > { %v1289_v17 = vld [vmem:[%s1371_s26 + $0x70] sm:$0xff]   ;;  %v1291_v19 = vld [vmem:[%s1371_s26 + $0x78] sm:$0xff]  }
  0x1b   : > { %1214 = vmatmul.mubr.msk.bf16.gmra.mrb[4].mxu0 %vm398_vm1, %v1282_v10 }
  0x1c   : > { %1230 = vmatmul.mubr.msk.bf16.gmra.mrb[4].mxu1 %vm398_vm1, %v1283_v11  ;;  %1217 = vmatprep.mubr.msk.bf16.mxu0 %vm398_vm1, %v1284_v12 }
  0x1d   : > { %1233 = vmatprep.mubr.msk.bf16.mxu1 %vm398_vm1, %v1285_v13 }
  0x23   : > { %1218 = vmatmul.mubr.msk.bf16.gmra.mrb[8].mxu0 %vm398_vm1, %v1286_v14 }
  0x24   : > { %1234 = vmatmul.mubr.msk.bf16.gmra.mrb[8].mxu1 %vm398_vm1, %v1287_v15  ;;  %1221 = vmatprep.mubr.msk.bf16.mxu0 %vm398_vm1, %v1288_v16 }
  0x25   : > { %1237 = vmatprep.mubr.msk.bf16.mxu1 %vm398_vm1, %v1289_v17 }
  0x2b   : > { %1222 = vmatmul.mubr.msk.bf16.gmra.mrb[12].mxu0 %vm398_vm1, %v1290_v18 }
  0x2c   : > { %1238 = vmatmul.mubr.msk.bf16.gmra.mrb[12].mxu1 %vm398_vm1, %v1291_v19 }
  0xe6   : > { %v1211_v20 = vpop.f32.mrb[0].mxu0 }
  0xe7   : > { %v1227_v22 = vpop.f32.mrb[0].mxu1  ;;  %v485_v23 = vpop.f32.mrb[1].mxu0  ;;  %v720_v27 = vadd.f32 %v1211_v20, %v1408_v21 }
  0xe8   : > { %v549_v24 = vpop.f32.mrb[1].mxu1  ;;  %v1212_v25 = vpop.f32.mrb[2].mxu0  ;;  %v736_v28 = vadd.f32 %v1227_v22, %v1408_v21  ;;  %v718_v33 = vadd.f32 %v1408_v21, %v485_v23 }
  0xe9   : > { %v1228_v26 = vpop.f32.mrb[2].mxu1  ;;  %v721_v29 = vadd.f32 %v1212_v25, %v1408_v21  ;;  %v488_v31 = vpop.f32.mrb[3].mxu0  ;;  %v734_v34 = vadd.f32 %v1408_v21, %v549_v24 }
  0xea   : > { %v737_v30 = vadd.f32 %v1228_v26, %v1408_v21  ;;  %v552_v32 = vpop.f32.mrb[3].mxu1  ;;  %v719_v35 = vadd.f32 %v1408_v21, %v488_v31 }
  0xeb   : > { %v735_v36 = vadd.f32 %v1408_v21, %v552_v32  ;;  %v1097_v37 = vpack.c.bf16 %v721_v29, %v720_v27 }
  0xec   : > { %v1137_v38 = vpack.c.bf16 %v737_v30, %v736_v28  ;;  %v1092_v39 = vpack.c.bf16 %v719_v35, %v718_v33 }
  0xed   : > { %v1132_v40 = vpack.c.bf16 %v735_v36, %v734_v34  ;;  %1169 = vst [vmem:[%s1421_s4 + $0x8] sm:$0xff] %v1097_v37  }
  0xee   : > { %1177 = vst [vmem:[%s1421_s4 + $0x48] sm:$0xff] %v1137_v38   ;;  %1093 = vst [vmem:[%s1421_s4] sm:$0xff] %v1092_v39   ;;  %v1215_v41 = vpop.f32.mrb[4].mxu0 }
  0xef   : > { %1176 = vst [vmem:[%s1421_s4 + $0x40] sm:$0xff] %v1132_v40   ;;  %v1231_v42 = vpop.f32.mrb[4].mxu1  ;;  %v501_v43 = vpop.f32.mrb[5].mxu0  ;;  %v724_v47 = vadd.f32 %v1215_v41, %v1408_v21 }
  0xf0   : > { %v565_v44 = vpop.f32.mrb[5].mxu1  ;;  %v1216_v45 = vpop.f32.mrb[6].mxu0  ;;  %v740_v48 = vadd.f32 %v1231_v42, %v1408_v21  ;;  %v722_v53 = vadd.f32 %v1408_v21, %v501_v43 }
  0xf1   : > { %v1232_v46 = vpop.f32.mrb[6].mxu1  ;;  %v725_v49 = vadd.f32 %v1216_v45, %v1408_v21  ;;  %v504_v51 = vpop.f32.mrb[7].mxu0  ;;  %v738_v54 = vadd.f32 %v1408_v21, %v565_v44 }
  0xf2   : > { %v741_v50 = vadd.f32 %v1232_v46, %v1408_v21  ;;  %v568_v52 = vpop.f32.mrb[7].mxu1  ;;  %v723_v55 = vadd.f32 %v1408_v21, %v504_v51 }
  0xf3   : > { %v739_v56 = vadd.f32 %v1408_v21, %v568_v52  ;;  %v1107_v57 = vpack.c.bf16 %v725_v49, %v724_v47 }
  0xf4   : > { %v1147_v58 = vpack.c.bf16 %v741_v50, %v740_v48  ;;  %v1102_v59 = vpack.c.bf16 %v723_v55, %v722_v53 }
  0xf5   : > { %v1142_v60 = vpack.c.bf16 %v739_v56, %v738_v54  ;;  %1171 = vst [vmem:[%s1421_s4 + $0x18] sm:$0xff] %v1107_v57  }
  0xf6   : > { %1179 = vst [vmem:[%s1421_s4 + $0x58] sm:$0xff] %v1147_v58   ;;  %1170 = vst [vmem:[%s1421_s4 + $0x10] sm:$0xff] %v1102_v59   ;;  %v1219_v61 = vpop.f32.mrb[8].mxu0 }
  0xf7   : > { %1178 = vst [vmem:[%s1421_s4 + $0x50] sm:$0xff] %v1142_v60   ;;  %v1235_v62 = vpop.f32.mrb[8].mxu1  ;;  %v517_v63 = vpop.f32.mrb[9].mxu0  ;;  %v728_v3 = vadd.f32 %v1219_v61, %v1408_v21 }
  0xf8   : > { %v581_v0 = vpop.f32.mrb[9].mxu1  ;;  %v1220_v1 = vpop.f32.mrb[10].mxu0  ;;  %v744_v4 = vadd.f32 %v1235_v62, %v1408_v21  ;;  %v726_v9 = vadd.f32 %v1408_v21, %v517_v63 }
  0xf9   : > { %v1236_v2 = vpop.f32.mrb[10].mxu1  ;;  %v729_v5 = vadd.f32 %v1220_v1, %v1408_v21  ;;  %v520_v7 = vpop.f32.mrb[11].mxu0  ;;  %v742_v10 = vadd.f32 %v1408_v21, %v581_v0 }
  0xfa   : > { %v745_v6 = vadd.f32 %v1236_v2, %v1408_v21  ;;  %v584_v8 = vpop.f32.mrb[11].mxu1  ;;  %v727_v11 = vadd.f32 %v1408_v21, %v520_v7 }
  0xfb   : > { %v743_v12 = vadd.f32 %v1408_v21, %v584_v8  ;;  %v1117_v13 = vpack.c.bf16 %v729_v5, %v728_v3 }
  0xfc   : > { %v1157_v14 = vpack.c.bf16 %v745_v6, %v744_v4  ;;  %v1112_v15 = vpack.c.bf16 %v727_v11, %v726_v9 }
  0xfd   : > { %v1152_v16 = vpack.c.bf16 %v743_v12, %v742_v10  ;;  %1173 = vst [vmem:[%s1421_s4 + $0x28] sm:$0xff] %v1117_v13  }
  0xfe   : > { %1181 = vst [vmem:[%s1421_s4 + $0x68] sm:$0xff] %v1157_v14   ;;  %1172 = vst [vmem:[%s1421_s4 + $0x20] sm:$0xff] %v1112_v15   ;;  %v1223_v17 = vpop.f32.mrb[12].mxu0 }
  0xff   : > { %1180 = vst [vmem:[%s1421_s4 + $0x60] sm:$0xff] %v1152_v16   ;;  %v1239_v18 = vpop.f32.mrb[12].mxu1  ;;  %v533_v19 = vpop.f32.mrb[13].mxu0  ;;  %v732_v24 = vadd.f32 %v1223_v17, %v1408_v21 }
 0x100   : > { %v597_v20 = vpop.f32.mrb[13].mxu1  ;;  %v1224_v22 = vpop.f32.mrb[14].mxu0  ;;  %v748_v25 = vadd.f32 %v1239_v18, %v1408_v21  ;;  %v730_v30 = vadd.f32 %v1408_v21, %v533_v19 }
 0x101   : > { %v1240_v23 = vpop.f32.mrb[14].mxu1  ;;  %v733_v26 = vadd.f32 %v1224_v22, %v1408_v21  ;;  %v536_v28 = vpop.f32.mrb[15].mxu0  ;;  %v746_v31 = vadd.f32 %v1408_v21, %v597_v20 }
 0x102   : > { %v749_v27 = vadd.f32 %v1240_v23, %v1408_v21  ;;  %v600_v29 = vpop.f32.mrb[15].mxu1  ;;  %v731_v32 = vadd.f32 %v1408_v21, %v536_v28 }
 0x103   : > { %v747_v33 = vadd.f32 %v1408_v21, %v600_v29  ;;  %v1127_v34 = vpack.c.bf16 %v733_v26, %v732_v24 }
 0x104   : > { %v1167_v35 = vpack.c.bf16 %v749_v27, %v748_v25  ;;  %v1122_v36 = vpack.c.bf16 %v731_v32, %v730_v30 }
 0x105   : > { %v1162_v37 = vpack.c.bf16 %v747_v33, %v746_v31  ;;  %1175 = vst [vmem:[%s1421_s4 + $0x38] sm:$0xff] %v1127_v34  }
 0x106   : > { %1183 = vst [vmem:[%s1421_s4 + $0x78] sm:$0xff] %v1167_v35   ;;  %1174 = vst [vmem:[%s1421_s4 + $0x30] sm:$0xff] %v1122_v36  }
 0x107   : > { %1182 = vst [vmem:[%s1421_s4 + $0x70] sm:$0xff] %v1162_v37  }
 0x108 PF: > { %s13_s14 = sadd.s32 1, %s1314_s14   ;;  %s1478_s12 = smov %s1310_s13 }
 0x109   : > { %p10_p5 = scmp.ge.s32.totalorder %s13_s14, 4   ;;  %s1479_s13 = smov %s1481_s15 }
 0x10b   :  { %12 = sbr.rel (!%p10_p5) target bundleno = 2 (0x2), region = 70 }

// kernel: down_block_forward.4
= control target key start
LH: loop header
LB: loop body
LE: loop exit
PB: predicated region body
PF: predicated region fallthrough
CT: control target
= control target key end

     0   :  { %s861_s15 = smov 0   ;;  %s863_s16 = smov 0   ;;  %s942_s0 = inlined_call_operand.vmem [shape: bf16[128,128], index: 0, kind: input, shape index: {}]   ;;  %s943_s1 = inlined_call_operand.vmem [shape: bf16[128,128], index: 1, kind: input, shape index: {}]   ;;  %s944_s2 = inlined_call_operand.vmem [shape: bf16[128,128], index: 2, kind: output, shape index: {0}]   ;;  %s945_s3 = inlined_call_operand.vmem [shape: f32[16,128], index: 3, kind: output, shape index: {1}]   ;;  %s946_s4 = inlined_call_operand.vmem [shape: f32[16,128], index: 4, kind: output, shape index: {2}]  }
   0x1   :  { %s865_s17 = smov 0  }
   0x2 LB: > { %s27_s18 = sadd.s32 1, %s830_s16  ;;  %p664_p0 = scmp.ge.s32.totalorder %s834_s17, 1  ;;  %s834_s17 = sphi %s865_s17, %s15_s17   ;;  %s830_s16 = sphi %s863_s16, %s948_s16   ;;  %s826_s15 = sphi %s861_s15, %s947_s15  }
   0x3   : > { %p29_p1 = scmp.ge.s32.totalorder %s27_s18, 2  ;;  %p185_p2 = scmp.lt.s32.totalorder %s834_s17, 3 }
   0x5   : > { %s950_s18 = smov (%p29_p1, %s27_s18), 0  ;;  %p186_p3 = pnand %p664_p0, %p185_p2 }
   0x6   : > { %v800_v0 = vld [vmem:[%s943_s1] sm:$0xff] (!%p186_p3)   ;;  %s665_s21 = sshll.u32 (!%p186_p3), %s826_s15, 3  ;;  %v801_v1 = vld [vmem:[%s943_s1 + $0x8] sm:$0xff] (!%p186_p3)   ;;  %v802_v2 = vld [vmem:[%s943_s1 + $0x10] sm:$0xff] (!%p186_p3)   ;;  %p237_p5 = scmp.lt.s32.totalorder (!%p186_p3), %s826_s15, 1 }
   0x7   : > { %189 = sbr.rel (%p186_p3) target bundleno = 283 (0x11b), region = 28  ;;  %p223_p4 = scmp.lt.s32.totalorder (!%p186_p3), %s665_s21, 15  ;;  %736 = vmatprep.subr.bf16.mxu0 (!%p186_p3), %v800_v0  ;;  %760 = vmatprep.subr.bf16.mxu1 (!%p186_p3), %v800_v0  ;;  %v803_v3 = vld [vmem:[%s943_s1 + $0x18] sm:$0xff] (!%p186_p3)   ;;  %v804_v6 = vld [vmem:[%s943_s1 + $0x20] sm:$0xff] (!%p186_p3)   ;;  %v805_v7 = vld [vmem:[%s943_s1 + $0x28] sm:$0xff] (!%p186_p3)  }
   0x8   : > { %737 = vmatpush3.bf16.msra.mxu0 (!%p186_p3), %v800_v0  ;;  %768 = vmatpush3.bf16.msra.mxu1 (!%p186_p3), %v800_v0  ;;  %v806_v8 = vld [vmem:[%s943_s1 + $0x30] sm:$0xff] (!%p186_p3)   ;;  %v807_v9 = vld [vmem:[%s943_s1 + $0x38] sm:$0xff] (!%p186_p3)  }
   0x9   : > { %738 = vmatprep.subr.bf16.mxu0 (!%p186_p3), %v801_v1  ;;  %761 = vmatprep.subr.bf16.mxu1 (!%p186_p3), %v801_v1 }
   0xc   : > { %739 = vmatpush3.bf16.msra.mxu0 (!%p186_p3), %v801_v1  ;;  %769 = vmatpush3.bf16.msra.mxu1 (!%p186_p3), %v801_v1 }
   0xd   : > { %740 = vmatprep.subr.bf16.mxu0 (!%p186_p3), %v802_v2  ;;  %762 = vmatprep.subr.bf16.mxu1 (!%p186_p3), %v802_v2 }
   0xe   : > { %s952_s21 = smov (!%p223_p4, %s665_s21), 15  ;;  %s954_s15 = smov (!%p237_p5, %s826_s15), 1 }
   0xf   : > { %s666_s26 = sshll.u32 %s952_s21, 2  ;;  %s669_s21 = sshll.u32 %s954_s15, 3 }
  0x10   : > { %s899_s29 = scalar_lea.vmem %s942_s0, %s666_s26  ;;  %741 = vmatpush3.bf16.msra.mxu0 %v802_v2  ;;  %770 = vmatpush3.bf16.msra.mxu1 %v802_v2  ;;  %s235_s20 = scalar_lea.vmem %s944_s2, %s666_s26 }
  0x11   : > { %v808_v4 = vld [vmem:[%s899_s29] sm:$0xff]   ;;  %v810_v5 = vld [vmem:[%s899_s29 + $0x10] sm:$0xff]   ;;  %742 = vmatprep.subr.bf16.mxu0 %v803_v3  ;;  %763 = vmatprep.subr.bf16.mxu1 %v803_v3  ;;  %v809_v10 = vld [vmem:[%s899_s29 + $0x8] sm:$0xff]   ;;  %s240_s24 = scalar_lea.vmem %s945_s3, %s669_s21  ;;  %s244_s27 = scalar_lea.vmem %s946_s4, %s669_s21 }
  0x12   : > { %752 = vmatprep.mubr.bf16.mxu0 %v808_v4  ;;  %756 = vmatprep.mubr.bf16.mxu1 %v810_v5  ;;  %v811_v11 = vld [vmem:[%s899_s29 + $0x18] sm:$0xff]  }
  0x14   : > { %743 = vmatpush3.bf16.msra.mxu0 %v803_v3  ;;  %771 = vmatpush3.bf16.msra.mxu1 %v803_v3 }
  0x15   : > { %744 = vmatprep.subr.bf16.mxu0 %v804_v6  ;;  %764 = vmatprep.subr.bf16.mxu1 %v804_v6 }
  0x18   : > { %745 = vmatpush3.bf16.msra.mxu0 %v804_v6  ;;  %772 = vmatpush3.bf16.msra.mxu1 %v804_v6 }
  0x19   : > { %746 = vmatprep.subr.bf16.mxu0 %v805_v7  ;;  %765 = vmatprep.subr.bf16.mxu1 %v805_v7 }
  0x1c   : > { %747 = vmatpush3.bf16.msra.mxu0 %v805_v7  ;;  %773 = vmatpush3.bf16.msra.mxu1 %v805_v7 }
  0x1d   : > { %748 = vmatprep.subr.bf16.mxu0 %v806_v8  ;;  %766 = vmatprep.subr.bf16.mxu1 %v806_v8 }
  0x20   : > { %749 = vmatpush3.bf16.msra.mxu0 %v806_v8  ;;  %774 = vmatpush3.bf16.msra.mxu1 %v806_v8 }
  0x21   : > { %750 = vmatprep.subr.bf16.mxu0 %v807_v9  ;;  %767 = vmatprep.subr.bf16.mxu1 %v807_v9 }
  0x24   : > { %751 = vmatpush3.bf16.msra.mxu0 %v807_v9  ;;  %775 = vmatpush3.bf16.msra.mxu1 %v807_v9 }
  0x27   : > { %753 = vmatmul.mubr.bf16.vlgmr.msra.gmra.mrb[0].mxu0 %v809_v10  ;;  %757 = vmatmul.mubr.bf16.vlgmr.msra.gmra.mrb[0].mxu1 %v811_v11 }
  0xfa   : > { %v754_v12 = vpop.f32.mrb[0].mxu0  ;;  %v758_v13 = vpop.f32.mrb[0].mxu1 }
  0xfb   : > { %v396_v14 = vpop.f32.mrb[1].mxu0  ;;  %v412_v15 = vpop.f32.mrb[1].mxu1  ;;  %v510_v27 = vmul.f32 %v754_v12, %v754_v12  ;;  %v514_v39 = vmul.f32 %v758_v13, %v758_v13 }
  0xfc   : > { %v755_v16 = vpop.f32.mrb[2].mxu0  ;;  %v759_v17 = vpop.f32.mrb[2].mxu1  ;;  %v508_v18 = vmul.f32 %v396_v14, %v396_v14  ;;  %v512_v33 = vmul.f32 %v412_v15, %v412_v15 }
  0xfd   : > { %v709_v19 = vpack.c.bf16 %v755_v16, %v754_v12  ;;  %v399_v20 = vpop.f32.mrb[3].mxu0  ;;  %v719_v21 = vpack.c.bf16 %v759_v17, %v758_v13  ;;  %v415_v22 = vpop.f32.mrb[3].mxu1  ;;  %v511_v30 = vmul.f32 %v755_v16, %v755_v16  ;;  %v515_v42 = vmul.f32 %v759_v17, %v759_v17 }
  0xfe   : > { %v704_v23 = vpack.c.bf16 %v399_v20, %v396_v14  ;;  %v494_v24 = vadd.f32 %v399_v20, %v396_v14  ;;  %v509_v25 = vmul.f32 %v399_v20, %v399_v20  ;;  %v714_v26 = vpack.c.bf16 %v415_v22, %v412_v15 }
  0xff   : > { %721 = vst [vmem:[%s235_s20 + $0x8] sm:$0xff] %v709_v19   ;;  %723 = vst [vmem:[%s235_s20 + $0x18] sm:$0xff] %v719_v21   ;;  %v513_v38 = vmul.f32 %v415_v22, %v415_v22 }
 0x100   : > { %705 = vst [vmem:[%s235_s20] sm:$0xff] %v704_v23   ;;  %v495_v28 = vadd.f32 %v754_v12, %v494_v24  ;;  %v516_v29 = vadd.f32 %v509_v25, %v508_v18  ;;  %722 = vst [vmem:[%s235_s20 + $0x10] sm:$0xff] %v714_v26  }
 0x102   : > { %v517_v31 = vadd.f32 %v516_v29, %v510_v27  ;;  %v496_v32 = vadd.f32 %v755_v16, %v495_v28 }
 0x104   : > { %v497_v34 = vadd.f32 %v496_v32, %v412_v15  ;;  %v518_v35 = vadd.f32 %v517_v31, %v511_v30 }
 0x106   : > { %v519_v36 = vadd.f32 %v518_v35, %v512_v33  ;;  %v498_v37 = vadd.f32 %v497_v34, %v415_v22 }
 0x108   : > { %v499_v40 = vadd.f32 %v758_v13, %v498_v37  ;;  %v520_v41 = vadd.f32 %v519_v36, %v513_v38 }
 0x10a   : > { %v500_v43 = vadd.f32 %v759_v17, %v499_v40  ;;  %v521_v44 = vadd.f32 %v520_v41, %v514_v39 }
 0x10c   : > { %v501_v45 = vrot.slane %v500_v43, 4  ;;  %v522_v46 = vadd.f32 %v521_v44, %v515_v42 }
 0x10e   : > { %v502_v47 = vadd.f32 %v501_v45, %v500_v43  ;;  %v523_v48 = vrot.slane %v522_v46, 4 }
 0x110   : > { %v503_v49 = vrot.slane %v502_v47, 2  ;;  %v524_v50 = vadd.f32 %v523_v48, %v522_v46 }
 0x112   : > { %v504_v51 = vadd.f32 %v503_v49, %v502_v47  ;;  %v525_v52 = vrot.slane %v524_v50, 2 }
 0x114   : > { %v505_v53 = vrot.slane %v504_v51, 1  ;;  %v526_v54 = vadd.f32 %v525_v52, %v524_v50 }
 0x116   : > { %v506_v55 = vadd.f32 %v505_v53, %v504_v51  ;;  %v527_v56 = vrot.slane %v526_v54, 1 }
 0x118   : > { %507 = vst [vmem:[%s240_s24] sm:$0xff] %v506_v55  ;;  %v528_v57 = vadd.f32 %v527_v56, %v526_v54 }
 0x11a   : > { %529 = vst [vmem:[%s244_s27] sm:$0xff] %v528_v57 }
 0x11b PF: > { %s15_s17 = sadd.s32 1, %s834_s17   ;;  %s947_s15 = smov %s830_s16 }
 0x11c   : > { %p12_p6 = scmp.ge.s32.totalorder %s15_s17, 4   ;;  %s948_s16 = smov %s950_s18 }
 0x11e   :  { %14 = sbr.rel (!%p12_p6) target bundleno = 2 (0x2), region = 90 }

// kernel: down_block_forward.5
= control target key start
LH: loop header
LB: loop body
LE: loop exit
PB: predicated region body
PF: predicated region fallthrough
CT: control target
= control target key end

     0   :  { %s503_s12 = smov 0   ;;  %s553_s0 = inlined_call_operand.vmem [shape: bf16[128,128], index: 0, kind: input, shape index: {}]   ;;  %s554_s1 = inlined_call_operand.vmem [shape: f32[1,128], index: 1, kind: input, shape index: {}]   ;;  %s555_s2 = inlined_call_operand.vmem [shape: f32[1,128], index: 2, kind: input, shape index: {}]   ;;  %s556_s3 = inlined_call_operand.vmem [shape: bf16[128,128], index: 3, kind: output, shape index: {}]  }
   0x1 LB: > { %s364_s13 = sadd.s32 4294967295, %s481_s12   ;;  %p368_p0 = scmp.ge.s32.totalorder %s481_s12, 1  ;;  %s481_s12 = sphi %s503_s12, %s13_s12  }
   0x2   : > { %p138_p1 = scmp.lt.s32.totalorder %s481_s12, 3 }
   0x4   : > { %p139_p2 = pnand %p368_p0, %p138_p1 }
   0x5   : > { %s369_s14 = sshll.u32 (!%p139_p2), %s364_s13, 3  ;;  %v373_v0 = vld [vmem:[%s554_s1] ss:$0 sm:$0xff] (!%p139_p2) }
   0x6   : > { %142 = sbr.rel (%p139_p2) target bundleno = 63 (0x3f), region = 32  ;;  %p163_p3 = scmp.lt.s32.totalorder (!%p139_p2), %s369_s14, 15  ;;  %v374_v9 = vld [vmem:[%s555_s2] ss:$0 sm:$0xff] (!%p139_p2) }
   0xd   : > { %s558_s14 = smov (!%p163_p3, %s369_s14), 15 }
   0xe   : > { %s370_s15 = sshll.u32 %s558_s14, 2 }
   0xf   : > { %s166_s18 = scalar_lea.vmem %s553_s0, %s370_s15  ;;  %s172_s25 = scalar_lea.vmem %s556_s3, %s370_s15 }
  0x10   : > { %v394_v1 = vld [vmem:[%s166_s18] sm:$0xff]   ;;  %v429_v2 = vld [vmem:[%s166_s18 + $0x8] sm:$0xff]   ;;  %v430_v3 = vld [vmem:[%s166_s18 + $0x10] sm:$0xff]  }
  0x11   : > { %v395_v4 = vunpack.c.l.bf16 %v394_v1  ;;  %v396_v5 = vunpack.c.h.bf16 %v394_v1  ;;  %v431_v6 = vld [vmem:[%s166_s18 + $0x18] sm:$0xff]   ;;  %v399_v7 = vunpack.c.l.bf16 %v429_v2  ;;  %v400_v8 = vunpack.c.h.bf16 %v429_v2 }
  0x12   : > { %v403_v10 = vunpack.c.l.bf16 %v430_v3  ;;  %v404_v11 = vunpack.c.h.bf16 %v430_v3  ;;  %v407_v12 = vunpack.c.l.bf16 %v431_v6  ;;  %v408_v13 = vunpack.c.h.bf16 %v431_v6 }
  0x13   : > { %v197_v14 = vmul.f32 %v395_v4, %v373_v0  ;;  %v198_v15 = vmul.f32 %v396_v5, %v373_v0  ;;  %v199_v16 = vmul.f32 %v399_v7, %v373_v0  ;;  %v200_v17 = vmul.f32 %v400_v8, %v373_v0 }
  0x14   : > { %v201_v18 = vmul.f32 %v403_v10, %v373_v0  ;;  %v202_v19 = vmul.f32 %v404_v11, %v373_v0  ;;  %v203_v20 = vmul.f32 %v407_v12, %v373_v0  ;;  %v204_v21 = vmul.f32 %v408_v13, %v373_v0 }
  0x15   : > { %v212_v22 = vadd.f32 %v374_v9, %v197_v14  ;;  %v213_v23 = vadd.f32 %v374_v9, %v198_v15  ;;  %v214_v24 = vadd.f32 %v374_v9, %v199_v16  ;;  %v525_v25 = vadd.f32 %v374_v9, %v200_v17 }
  0x16   : > { %v527_v26 = vadd.f32 %v374_v9, %v201_v18  ;;  %v529_v27 = vadd.f32 %v374_v9, %v202_v19  ;;  %v531_v28 = vadd.f32 %v374_v9, %v203_v20  ;;  %v533_v29 = vadd.f32 %v374_v9, %v204_v21 }
  0x17   : > { %v220_v30 = vsub.f32 0.0, %v212_v22  ;;  %v221_v31 = vsub.f32 0.0, %v213_v23  ;;  %v222_v32 = vsub.f32 0.0, %v214_v24  ;;  %v223_v33 = vsub.f32 0.0, %v525_v25 }
  0x18   : > { %v224_v34 = vsub.f32 0.0, %v527_v26  ;;  %v225_v35 = vsub.f32 0.0, %v529_v27  ;;  %v226_v36 = vsub.f32 0.0, %v531_v28  ;;  %v227_v41 = vsub.f32 0.0, %v533_v29 }
  0x19   : > { %v228_v37 = vmul.f32 1.442695, %v220_v30  ;;  %v230_v38 = vmul.f32 1.442695, %v221_v31  ;;  %v232_v39 = vmul.f32 1.442695, %v222_v32 }
  0x1a   : > { %v234_v40 = vmul.f32 1.442695, %v223_v33  ;;  %v236_v42 = vmul.f32 1.442695, %v224_v34  ;;  %v238_v43 = vmul.f32 1.442695, %v225_v35 }
  0x1b   : > { %443 = vpow2.f32 %v228_v37  ;;  %v240_v44 = vmul.f32 1.442695, %v226_v36  ;;  %v242_v45 = vmul.f32 1.442695, %v227_v41 }
  0x1c   : > { %445 = vpow2.f32 %v230_v38 }
  0x1d   : > { %447 = vpow2.f32 %v232_v39 }
  0x1e   : > { %449 = vpow2.f32 %v234_v40 }
  0x1f   : > { %451 = vpow2.f32 %v236_v42 }
  0x20   : > { %453 = vpow2.f32 %v238_v43 }
  0x21   : > { %455 = vpow2.f32 %v240_v44 }
  0x22   : > { %457 = vpow2.f32 %v242_v45 }
  0x25   : > { %v444_v46 = vpop.eup %443 }
  0x26   : > { %v446_v47 = vpop.eup %445  ;;  %v244_v48 = vadd.f32 1.0, %v444_v46 }
  0x27   : > { %v448_v49 = vpop.eup %447  ;;  %v245_v50 = vadd.f32 1.0, %v446_v47 }
  0x28   : > { %v450_v51 = vpop.eup %449  ;;  %459 = vrcp.f32 %v244_v48  ;;  %v246_v52 = vadd.f32 1.0, %v448_v49 }
  0x29   : > { %v452_v53 = vpop.eup %451  ;;  %461 = vrcp.f32 %v245_v50  ;;  %v247_v54 = vadd.f32 1.0, %v450_v51 }
  0x2a   : > { %v454_v55 = vpop.eup %453  ;;  %463 = vrcp.f32 %v246_v52  ;;  %v248_v56 = vadd.f32 1.0, %v452_v53 }
  0x2b   : > { %v456_v57 = vpop.eup %455  ;;  %465 = vrcp.f32 %v247_v54  ;;  %v249_v58 = vadd.f32 1.0, %v454_v55 }
  0x2c   : > { %v458_v59 = vpop.eup %457  ;;  %467 = vrcp.f32 %v248_v56  ;;  %v250_v60 = vadd.f32 1.0, %v456_v57 }
  0x2d   : > { %469 = vrcp.f32 %v249_v58  ;;  %v251_v61 = vadd.f32 1.0, %v458_v59 }
  0x2e   : > { %471 = vrcp.f32 %v250_v60 }
  0x2f   : > { %473 = vrcp.f32 %v251_v61 }
  0x32   : > { %v460_v62 = vpop.eup %459 }
  0x33   : > { %v462_v63 = vpop.eup %461  ;;  %v260_v0 = vmul.f32 %v460_v62, %v212_v22 }
  0x34   : > { %v464_v1 = vpop.eup %463  ;;  %v261_v2 = vmul.f32 %v462_v63, %v213_v23 }
  0x35   : > { %v466_v3 = vpop.eup %465  ;;  %v262_v4 = vmul.f32 %v464_v1, %v214_v24 }
  0x36   : > { %v468_v5 = vpop.eup %467  ;;  %v412_v6 = vpack.c.bf16 %v261_v2, %v260_v0  ;;  %v263_v7 = vmul.f32 %v466_v3, %v525_v25 }
  0x37   : > { %v470_v8 = vpop.eup %469  ;;  %v264_v9 = vmul.f32 %v468_v5, %v527_v26 }
  0x38   : > { %v472_v10 = vpop.eup %471  ;;  %413 = vst [vmem:[%s172_s25] sm:$0xff] %v412_v6   ;;  %v417_v11 = vpack.c.bf16 %v263_v7, %v262_v4  ;;  %v265_v12 = vmul.f32 %v470_v8, %v529_v27 }
  0x39   : > { %v474_v13 = vpop.eup %473  ;;  %v266_v14 = vmul.f32 %v472_v10, %v531_v28 }
  0x3a   : > { %432 = vst [vmem:[%s172_s25 + $0x8] sm:$0xff] %v417_v11   ;;  %v422_v15 = vpack.c.bf16 %v265_v12, %v264_v9  ;;  %v267_v16 = vmul.f32 %v474_v13, %v533_v29 }
  0x3c   : > { %433 = vst [vmem:[%s172_s25 + $0x10] sm:$0xff] %v422_v15   ;;  %v427_v17 = vpack.c.bf16 %v267_v16, %v266_v14 }
  0x3e   : > { %434 = vst [vmem:[%s172_s25 + $0x18] sm:$0xff] %v427_v17  }
  0x3f PF: > { %s13_s12 = sadd.s32 1, %s481_s12  }
  0x40   : > { %p10_p4 = scmp.ge.s32.totalorder %s13_s12, 4  }
  0x42   :  { %12 = sbr.rel (!%p10_p4) target bundleno = 1 (0x1), region = 62 }

</bundles_post_ra>
